<compile_context>
chip_gen: v7x
topology: tpu7x:2x2x1
jax: 0.10.0
libtpu: 0.0.40
codegen_flags: <defaults>
</compile_context>

<pallas_src>
import functools

import jax
import jax.numpy as jnp
from jax import lax
from jax.experimental import pallas as pl
from jax.experimental.pallas import tpu as pltpu


_EPS = 1e-5
_STATS_PARTS = 2                      # leading "parallel" axis for phase 1
_MiB = 1024 * 1024


def _sublane_multiple(dtype):
    return {4: 8, 2: 16, 1: 32}.get(jnp.dtype(dtype).itemsize, 8)


def _vmem_limit_bytes():
    """Generation-aware scoped-VMEM limit (~72% of physical capacity)."""
    try:
        cap = int(pltpu.get_tpu_info().vmem_capacity_bytes)
    except Exception:
        cap = 64 * _MiB               # conservative (v7x per-TC)
    return int(cap * 0.72)


def _pick_tile_rows(n_work, e_work, dtype, block_bytes, sublane):
    """Largest row tile (multiple of `sublane`, <= n_work) fitting block_bytes."""
    itemsize = jnp.dtype(dtype).itemsize
    rows = (block_bytes // max(1, e_work * itemsize)) // sublane * sublane
    rows = max(sublane, rows)
    rows = min(rows, max(sublane, (n_work // sublane) * sublane))
    return rows


# ---------------------------------------------------------------------------
# Fast path: whole problem resident in VMEM, stats + normalize in one body.
# ---------------------------------------------------------------------------
def _fused_kernel(x_ref, gamma_ref, rv_ref, y_ref, new_rv_ref, *,
                  n_rows, fold, emb):
    x = x_ref[...].astype(jnp.float32)                     # (n_work, e_work)
    s = jnp.sum(x, axis=0, keepdims=True)
    sq = jnp.sum(x * x, axis=0, keepdims=True)
    if fold > 1:                                           # combine lane groups
        s = sum(s[:, g * emb:(g + 1) * emb] for g in range(fold))
        sq = sum(sq[:, g * emb:(g + 1) * emb] for g in range(fold))
    inv_n = 1.0 / n_rows
    mean = s * inv_n
    # TODO(synk): single-pass E[x^2]-E[x]^2 loses precision when |mean| >> std.
    var = jnp.maximum(sq * inv_n - mean * mean, 0.0)       # biased variance
    scale = gamma_ref[...].astype(jnp.float32) * lax.rsqrt(var + _EPS)
    new_rv_ref[...] = (0.1 * var + 0.9 * rv_ref[...].astype(jnp.float32)
                       ).astype(new_rv_ref.dtype)
    if fold > 1:
        scale = jnp.concatenate([scale] * fold, axis=1)
    y_ref[...] = (x * scale).astype(y_ref.dtype)


# ---------------------------------------------------------------------------
# Streaming phase 1: per-part, per-sublane partial sums and sums of squares.
# ---------------------------------------------------------------------------
def _partial_stats_kernel(x_ref, sum_ref, sq_ref, *,
                          n_work, rows_per_part, part_stride):
    p = pl.program_id(0)
    t = pl.program_id(1)

    @pl.when(t == 0)
    def _init():
        sum_ref[...] = jnp.zeros_like(sum_ref)
        sq_ref[...] = jnp.zeros_like(sq_ref)

    xt = x_ref[...].astype(jnp.float32)                    # (tile_n, e_work)
    tile_n, e_work = xt.shape
    start = (p * part_stride + t) * tile_n                 # first global row
    lo = p * rows_per_part                                 # rows < lo: part 0's

    def accumulate(vals):
        # Per-sublane partial sums: pure VPU adds in the steady state; the
        # cross-sublane (XLU) reduce happens once on tiny arrays in the wrapper.
        x3 = vals.reshape(tile_n // 8, 8, e_work)
        sum_ref[...] += jnp.sum(x3, axis=0)
        sq_ref[...] += jnp.sum(x3 * x3, axis=0)

    interior = (start >= lo) & (start + tile_n <= n_work)

    @pl.when(interior)
    def _fast():
        accumulate(xt)

    @pl.when(jnp.logical_not(interior))
    def _masked():                                          # boundary tiles only
        row = start + lax.broadcasted_iota(jnp.int32, (tile_n, e_work), 0)
        accumulate(jnp.where((row >= lo) & (row < n_work), xt, 0.0))


# ---------------------------------------------------------------------------
# Streaming phase 2 (also the eval-path normalize): y = x * scale.
# ---------------------------------------------------------------------------
def _norm_kernel(x_ref, scale_ref, y_ref):
    y_ref[...] = (x_ref[...].astype(jnp.float32) * scale_ref[...]
                  ).astype(y_ref.dtype)


# ---------------------------------------------------------------------------
# Wrapper
# ---------------------------------------------------------------------------
def bnorm1d_forward(x, gamma, run_var, training=True, *,
                    force_streaming=False,
                    stats_block_bytes=None, norm_block_bytes=None):
    """x: (B, S, E); gamma, run_var: (E,).  Returns (y, new_run_var)."""
    B, S, E = x.shape
    N = B * S
    dt = x.dtype
    itemsize = jnp.dtype(dt).itemsize
    sublane = _sublane_multiple(dt)
    vmem_limit = _vmem_limit_bytes()

    # Lane-dense folding (free row-major reshape) when E divides 128 evenly.
    fold = 128 // E if (E < 128 and 128 % E == 0 and N % (128 // E) == 0) else 1
    n_work, e_work = N // fold, fold * E
    xw = x.reshape(n_work, e_work)

    gamma_f = gamma.reshape(1, E).astype(jnp.float32)
    rv_f = run_var.reshape(1, E).astype(jnp.float32)

    fits_vmem = n_work * e_work * (2 * itemsize + 8) <= vmem_limit // 2
    small = (fits_vmem and not force_streaming) or (n_work < sublane)

    # ---------------- fast path (training): fused stats + normalize ----------
    if training and small:
        kernel = functools.partial(_fused_kernel, n_rows=float(N),
                                   fold=fold, emb=E)
        y_w, new_rv = pl.pallas_call(
            kernel,
            out_shape=(jax.ShapeDtypeStruct((n_work, e_work), dt),
                       jax.ShapeDtypeStruct((1, E), jnp.float32)),
            compiler_params=pltpu.CompilerParams(vmem_limit_bytes=vmem_limit),
        )(xw, gamma_f, rv_f)
        return y_w.reshape(B, S, E), new_rv.reshape(E).astype(run_var.dtype)

    # ---------------- phase 1: streamed statistics ---------------------------
    if training:
        blk1 = stats_block_bytes or max(_MiB // 2, min(8 * _MiB, vmem_limit // 8))
        tile1 = _pick_tile_rows(n_work, e_work, dt, blk1, sublane)
        t_total = pl.cdiv(n_work, tile1)
        t_part = -(-t_total // _STATS_PARTS)               # ceil(t_total / 2)
        part_stride = t_total - t_part                     # part 1's first tile

        stats = functools.partial(_partial_stats_kernel,
                                  n_work=n_work,
                                  rows_per_part=t_part * tile1,
                                  part_stride=part_stride)
        sum_p, sq_p = pl.pallas_call(
            stats,
            grid=(_STATS_PARTS, t_part),
            in_specs=[pl.BlockSpec((tile1, e_work),
                                   lambda p, t: (p * part_stride + t, 0))],
            out_specs=[pl.BlockSpec((8, e_work), lambda p, t: (p, 0)),
                       pl.BlockSpec((8, e_work), lambda p, t: (p, 0))],
            out_shape=(jax.ShapeDtypeStruct((_STATS_PARTS * 8, e_work), jnp.float32),
                       jax.ShapeDtypeStruct((_STATS_PARTS * 8, e_work), jnp.float32)),
            compiler_params=pltpu.CompilerParams(
                dimension_semantics=("parallel", "arbitrary"),
                vmem_limit_bytes=vmem_limit),
        )(xw)

        # Tiny finalize on (16, E_work): cross-sublane/part reduce, variance,
        # scale, running-var update (negligible vs. the streamed passes).
        s = jnp.sum(sum_p, axis=0)
        sq = jnp.sum(sq_p, axis=0)
        if fold > 1:
            s = s.reshape(fold, E).sum(axis=0)
            sq = sq.reshape(fold, E).sum(axis=0)
        inv_n = 1.0 / N
        mean = s * inv_n
        var = jnp.maximum(sq * inv_n - mean * mean, 0.0)   # biased variance
        new_run_var = (0.1 * var + 0.9 * run_var.astype(jnp.float32)
                       ).astype(run_var.dtype)
    else:
        var = run_var.astype(jnp.float32)
        new_run_var = run_var

    scale = gamma_f * lax.rsqrt(var.reshape(1, E) + _EPS)
    scale_w = jnp.tile(scale, (1, fold)) if fold > 1 else scale

    # ---------------- phase 2: streamed (or resident) normalize --------------
    if small:
        y_w = pl.pallas_call(
            _norm_kernel,
            out_shape=jax.ShapeDtypeStruct((n_work, e_work), dt),
            compiler_params=pltpu.CompilerParams(vmem_limit_bytes=vmem_limit),
        )(xw, scale_w)
    else:
        blk2 = norm_block_bytes or max(_MiB // 2, min(8 * _MiB, vmem_limit // 10))
        tile2 = _pick_tile_rows(n_work, e_work, dt, blk2, sublane)
        y_w = pl.pallas_call(
            _norm_kernel,
            grid=(pl.cdiv(n_work, tile2),),
            in_specs=[pl.BlockSpec((tile2, e_work), lambda i: (i, 0)),
                      pl.BlockSpec((1, e_work), lambda i: (0, 0))],
            out_specs=pl.BlockSpec((tile2, e_work), lambda i: (i, 0)),
            out_shape=jax.ShapeDtypeStruct((n_work, e_work), dt),
            compiler_params=pltpu.CompilerParams(
                dimension_semantics=("parallel",),
                vmem_limit_bytes=vmem_limit),
        )(xw, scale_w)

    return y_w.reshape(B, S, E), new_run_var


# ---------------------------------------------------------------------------
# Reference + tests
# ---------------------------------------------------------------------------
def _reference(x, gamma, run_var):
    var = jnp.var(x.astype(jnp.float32), axis=(0, 1))      # biased (ddof=0)
    new_rv = 0.1 * var + 0.9 * run_var.astype(jnp.float32)
    std = jnp.sqrt(var + _EPS)
    return (gamma * (x / std)).astype(x.dtype), new_rv


def _check(B, S, E, key, **kwargs):
    kx, kg, kr = jax.random.split(key, 3)
    x = jax.random.normal(kx, (B, S, E), dtype=jnp.float32)
    gamma = jax.random.normal(kg, (E,), dtype=jnp.float32)
    run_var = jax.random.uniform(kr, (E,), dtype=jnp.float32,
                                 minval=0.5, maxval=1.5)
    y, new_rv = bnorm1d_forward(x, gamma, run_var, **kwargs)
    jax.block_until_ready((y, new_rv))
    y_ref, rv_ref = _reference(x, gamma, run_var)
    assert jnp.allclose(y, y_ref, atol=1e-4, rtol=1e-4), f"y mismatch {(B, S, E)}"
    assert jnp.allclose(new_rv, rv_ref, atol=1e-4, rtol=1e-4), f"rv mismatch {(B, S, E)}"


if __name__ == "__main__":
    # Primary demo shape (matches module usage): batch=2, seq=8, emb=32.
    B, S, E = 2, 8, 32
    key = jax.random.PRNGKey(0)
    x = jax.random.normal(key, (B, S, E), dtype=jnp.float32)
    gamma = jnp.ones((E,), dtype=jnp.float32)               # as in BNorm1d.__init__
    run_var = jnp.ones((E,), dtype=jnp.float32)

    y, new_run_var = bnorm1d_forward(x, gamma, run_var, training=True)
    jax.block_until_ready((y, new_run_var))
    y_ref, rv_ref = _reference(x, gamma, run_var)
    assert jnp.allclose(y, y_ref, atol=1e-4, rtol=1e-4)
    assert jnp.allclose(new_run_var, rv_ref, atol=1e-4, rtol=1e-4)

    # Eval path: var taken from the running buffer.
    y_eval, rv_eval = bnorm1d_forward(x, gamma, run_var, training=False)
    jax.block_until_ready((y_eval, rv_eval))
    assert jnp.allclose(y_eval, gamma * x / jnp.sqrt(run_var + _EPS),
                        atol=1e-4, rtol=1e-4)
    assert jnp.allclose(rv_eval, run_var)

    # Fast-path shapes (aligned and unaligned E).
    _check(4, 384, 256, jax.random.PRNGKey(1))
    _check(1, 100, 200, jax.random.PRNGKey(2))

    # Streaming path, default (large) tiles.
    _check(8, 1024, 512, jax.random.PRNGKey(3), force_streaming=True)

    # Streaming path, tiny tile override: multi-tile accumulation, two-part
    # split with overlap masking, ragged last tile, unaligned E.
    _check(2, 999, 200, jax.random.PRNGKey(4), force_streaming=True,
           stats_block_bytes=64 * 1024, norm_block_bytes=64 * 1024)

    # Streaming path with lane-dense folding (E=64 -> 128-lane work layout).
    _check(4, 256, 64, jax.random.PRNGKey(5), force_streaming=True,
           stats_block_bytes=32 * 1024, norm_block_bytes=32 * 1024)

    print("KERNEL_OK")
</pallas_src>

<mosaic_0001>
module attributes {stable_mosaic.version = 11 : i64} {
  func.func @_fused_kernel(%arg0: memref<4x128xf32, #tpu.memory_space<vmem>>, %arg1: memref<1x32xf32, #tpu.memory_space<vmem>>, %arg2: memref<1x32xf32, #tpu.memory_space<vmem>>, %arg3: memref<4x128xf32, #tpu.memory_space<vmem>>, %arg4: memref<1x32xf32, #tpu.memory_space<vmem>>) attributes {dimension_semantics = [], scalar_prefetch = 0 : i64, scratch_operands = 0 : i64, tpu.core_type = #tpu.core_type<tc>} {
    %c0 = arith.constant 0 : index
    %c0_0 = arith.constant 0 : index
    %0 = vector.load %arg0[%c0, %c0_0] : memref<4x128xf32, #tpu.memory_space<vmem>>, vector<4x128xf32>
    %cst = arith.constant dense<0.000000e+00> : vector<128xf32>
    %1 = vector.multi_reduction <add>, %0, %cst [0] : vector<4x128xf32> to vector<128xf32>
    %2 = vector.shape_cast %1 : vector<128xf32> to vector<1x128xf32>
    %3 = arith.mulf %0, %0 : vector<4x128xf32>
    %cst_1 = arith.constant dense<0.000000e+00> : vector<128xf32>
    %4 = vector.multi_reduction <add>, %3, %cst_1 [0] : vector<4x128xf32> to vector<128xf32>
    %5 = vector.shape_cast %4 : vector<128xf32> to vector<1x128xf32>
    %6 = vector.extract_strided_slice %2 {offsets = [0, 0], sizes = [1, 32], strides = [1, 1]} : vector<1x128xf32> to vector<1x32xf32>
    %cst_2 = arith.constant 0.000000e+00 : f32
    %7 = vector.broadcast %cst_2 : f32 to vector<1x32xf32>
    %8 = arith.addf %7, %6 : vector<1x32xf32>
    %9 = vector.extract_strided_slice %2 {offsets = [0, 32], sizes = [1, 32], strides = [1, 1]} : vector<1x128xf32> to vector<1x32xf32>
    %10 = arith.addf %8, %9 : vector<1x32xf32>
    %11 = vector.extract_strided_slice %2 {offsets = [0, 64], sizes = [1, 32], strides = [1, 1]} : vector<1x128xf32> to vector<1x32xf32>
    %12 = arith.addf %10, %11 : vector<1x32xf32>
    %13 = vector.extract_strided_slice %2 {offsets = [0, 96], sizes = [1, 32], strides = [1, 1]} : vector<1x128xf32> to vector<1x32xf32>
    %14 = arith.addf %12, %13 : vector<1x32xf32>
    %15 = vector.extract_strided_slice %5 {offsets = [0, 0], sizes = [1, 32], strides = [1, 1]} : vector<1x128xf32> to vector<1x32xf32>
    %cst_3 = arith.constant 0.000000e+00 : f32
    %16 = vector.broadcast %cst_3 : f32 to vector<1x32xf32>
    %17 = arith.addf %16, %15 : vector<1x32xf32>
    %18 = vector.extract_strided_slice %5 {offsets = [0, 32], sizes = [1, 32], strides = [1, 1]} : vector<1x128xf32> to vector<1x32xf32>
    %19 = arith.addf %17, %18 : vector<1x32xf32>
    %20 = vector.extract_strided_slice %5 {offsets = [0, 64], sizes = [1, 32], strides = [1, 1]} : vector<1x128xf32> to vector<1x32xf32>
    %21 = arith.addf %19, %20 : vector<1x32xf32>
    %22 = vector.extract_strided_slice %5 {offsets = [0, 96], sizes = [1, 32], strides = [1, 1]} : vector<1x128xf32> to vector<1x32xf32>
    %23 = arith.addf %21, %22 : vector<1x32xf32>
    %cst_4 = arith.constant 6.250000e-02 : f32
    %24 = vector.broadcast %cst_4 : f32 to vector<1x32xf32>
    %25 = arith.mulf %14, %24 : vector<1x32xf32>
    %cst_5 = arith.constant 6.250000e-02 : f32
    %26 = vector.broadcast %cst_5 : f32 to vector<1x32xf32>
    %27 = arith.mulf %23, %26 : vector<1x32xf32>
    %28 = arith.mulf %25, %25 : vector<1x32xf32>
    %29 = arith.subf %27, %28 : vector<1x32xf32>
    %cst_6 = arith.constant 0.000000e+00 : f32
    %30 = vector.broadcast %cst_6 : f32 to vector<1x32xf32>
    %31 = arith.maximumf %29, %30 : vector<1x32xf32>
    %c0_7 = arith.constant 0 : index
    %c0_8 = arith.constant 0 : index
    %32 = vector.load %arg1[%c0_7, %c0_8] : memref<1x32xf32, #tpu.memory_space<vmem>>, vector<1x32xf32>
    %cst_9 = arith.constant 9.99999974E-6 : f32
    %33 = vector.broadcast %cst_9 : f32 to vector<1x32xf32>
    %34 = arith.addf %31, %33 : vector<1x32xf32>
    %35 = math.rsqrt %34 : vector<1x32xf32>
    %36 = arith.mulf %32, %35 : vector<1x32xf32>
    %cst_10 = arith.constant 1.000000e-01 : f32
    %37 = vector.broadcast %cst_10 : f32 to vector<1x32xf32>
    %38 = arith.mulf %37, %31 : vector<1x32xf32>
    %c0_11 = arith.constant 0 : index
    %c0_12 = arith.constant 0 : index
    %39 = vector.load %arg2[%c0_11, %c0_12] : memref<1x32xf32, #tpu.memory_space<vmem>>, vector<1x32xf32>
    %cst_13 = arith.constant 0.899999976 : f32
    %40 = vector.broadcast %cst_13 : f32 to vector<1x32xf32>
    %41 = arith.mulf %40, %39 : vector<1x32xf32>
    %42 = arith.addf %38, %41 : vector<1x32xf32>
    %c0_14 = arith.constant 0 : index
    %c0_15 = arith.constant 0 : index
    %43 = vector.load %arg4[%c0_14, %c0_15] : memref<1x32xf32, #tpu.memory_space<vmem>>, vector<1x32xf32>
    tpu.vector_store %arg4[%c0_14, %c0_15], %42 {strides = array<i32>} : memref<1x32xf32, #tpu.memory_space<vmem>>, vector<1x32xf32>,
    %44 = tpu.concatenate %36, %36, %36, %36 in 1 : vector<1x32xf32>, vector<1x32xf32>, vector<1x32xf32>, vector<1x32xf32> -> vector<1x128xf32>
    %45 = vector.broadcast %44 : vector<1x128xf32> to vector<4x128xf32>
    %46 = arith.mulf %0, %45 : vector<4x128xf32>
    %c0_16 = arith.constant 0 : index
    %c0_17 = arith.constant 0 : index
    %47 = vector.load %arg3[%c0_16, %c0_17] : memref<4x128xf32, #tpu.memory_space<vmem>>, vector<4x128xf32>
    tpu.vector_store %arg3[%c0_16, %c0_17], %46 {strides = array<i32>} : memref<4x128xf32, #tpu.memory_space<vmem>>, vector<4x128xf32>,
    return
  }
}

</mosaic_0001>

<bundles_post_ra>
// kernel: tpu_custom_call.1
= control target key start
LH: loop header
LB: loop body
LE: loop exit
PB: predicated region body
PF: predicated region fallthrough
CT: control target
= control target key end

     0   :  { %10 = vsyncpa [#allocation3], 0  ;;  %s313_s0 = inlined_call_operand.hbm [shape: f32[4,128], index: 0, kind: input, shape index: {}]   ;;  %s314_s1 = inlined_call_operand.vmem [shape: f32[1,32], index: 1, kind: input, shape index: {}]   ;;  %s315_s2 = inlined_call_operand.vmem [shape: f32[1,32], index: 2, kind: input, shape index: {}]   ;;  %s316_s3 = inlined_call_operand.hbm [shape: f32[4,128], index: 3, kind: output, shape index: {0}]   ;;  %s317_s4 = inlined_call_operand.hbm [shape: f32[1,32], index: 4, kind: output, shape index: {1}]  }
   0x1   :  { %11 = vsyncpa [#allocation4], 0 }
   0x2   :  { %12 = vsyncpa [#allocation7], 0  ;;  %s225_s15 = smov [#allocation2]   ;;  %s153_s19 = scalar_lea.hbm %s313_s0, 64 }
   0x3   :  { %s19_s16 = sshll.u32 %s225_s15, 4  ;;  %p154_p0 = scmp.ne.s32.totalorder %s313_s0, %s153_s19  ;;  %s20_s16 = int_to_ptr.vmem [resolvable:$true] %s19_s16 }
   0x4   :  { %p157_p1 = scmp.lt.u32.totalorder %s153_s19, %s313_s0 }
   0x6   :  { %p159_p2 = pnand %p157_p1, %p154_p0 }
   0x8   :  { %162 = shalt.err (!%p159_p2)
}
   0x9   :  { %s163_s24 = scalar_lea.vmem %s20_s16, 64  ;;  %p168_p4 = scmp.lt.s32.totalorder %s20_s16, %s20_s16 }
   0xa   :  { %p164_p3 = scmp.ne.s32.totalorder %s20_s16, %s163_s24  ;;  %p169_p5 = scmp.lt.s32.totalorder %s163_s24, %s163_s24 }
   0xc   :  { %p170_p6 = por %p169_p5, %p168_p4 }
   0xe   :  { %p171_p7 = pnand %p170_p6, %p164_p3 }
  0x10   :  { %174 = shalt.err (!%p171_p7)
}
  0x11   :  { %22 = dma.hbm_to_vmem [thread:$0]  %s313_s0, 64, %s20_s16, [#allocation3]  }
  0x12   :  { %219 = dma.done.wait [#allocation3], 64  }
  0x13   :  { %220 = vsyncadd [#allocation3], 4294967232  ;;  %vm31_vm0 = vcmask 1043456   ;;  %v268_v0 = vld [vmem:[#allocation2] sm:$0xf]  ;;  %s226_s0 = smov 96   ;;  %v91_v38 = vlaneseq }
  0x14   :  { %v32_v1 = vsel %vm31_vm0, %v268_v0, 0.0  ;;  %v39_v2 = vmul.f32 %v268_v0, %v268_v0  ;;  %s227_s27 = smov 32   ;;  %s228_s28 = smov 64   ;;  %v85_v31 = vld [vmem:[%s315_s2] sm:$0x1]  ;;  %vm88_vm1 = vcmask 253952  }
  0x15   :  { %v33_v3 = vrot.slane %v32_v1, 4  ;;  %v86_v34 = vmul.f32 0.9, %v85_v31  ;;  %v92_v39 = vshrl.u32 %v91_v38, 7  ;;  %v80_v40 = vld [vmem:[%s314_s1] sm:$0x1] }
  0x16   :  { %v40_v4 = vsel %vm31_vm0, %v39_v2, 0.0  ;;  %s229_s7 = smov [#allocation6]  }
  0x17   :  { %v34_v5 = vadd.f32 %v33_v3, %v32_v1  ;;  %v41_v6 = vrot.slane %v40_v4, 4  ;;  %v93_v41 = vsub.s32 0, %v92_v39  ;;  %s132_s8 = sshll.u32 %s229_s7, 4  ;;  %s133_s8 = int_to_ptr.vmem [resolvable:$true] %s132_s8 }
  0x18   :  { %s175_s2 = scalar_lea.vmem %s133_s8, 16  ;;  %s179_s9 = scalar_lea.vmem %s133_s8, 32 }
  0x19   :  { %v35_v7 = vrot.slane %v34_v5, 2  ;;  %v42_v8 = vadd.f32 %v41_v6, %v40_v4  ;;  %p176_p8 = scmp.ne.s32.totalorder %s133_s8, %s175_s2  ;;  %p180_p9 = scmp.lt.s32.totalorder %s133_s8, %s133_s8 }
  0x1a   :  { %p181_p10 = scmp.lt.s32.totalorder %s179_s9, %s175_s2 }
  0x1b   :  { %v36_v9 = vadd.f32 %v35_v7, %v34_v5  ;;  %v43_v10 = vrot.slane %v42_v8, 2 }
  0x1c   :  { %p182_p11 = por %p181_p10, %p180_p9 }
  0x1d   :  { %v37_v11 = vrot.slane %v36_v9, 1  ;;  %v44_v12 = vadd.f32 %v43_v10, %v42_v8 }
  0x1e   :  { %p183_p12 = pnand %p182_p11, %p176_p8 }
  0x1f   :  { %v38_v13 = vadd.f32 %v37_v11, %v36_v9  ;;  %v45_v14 = vrot.slane %v44_v12, 1 }
  0x21   :  { %49 = vrot.lane.b32.xlu0 %v38_v13, %s226_s0  ;;  %57 = vrot.lane.b32.xlu1 %v38_v13, %s227_s27  ;;  %v46_v15 = vadd.f32 %v45_v14, %v44_v12 }
  0x25   :  { %53 = vrot.lane.b32.xlu0 %v38_v13, %s228_s28  ;;  %63 = vrot.lane.b32.xlu1 %v46_v15, %s226_s0 }
  0x29   :  { %67 = vrot.lane.b32.xlu0 %v46_v15, %s228_s28  ;;  %71 = vrot.lane.b32.xlu1 %v46_v15, %s227_s27 }
  0x93   :  { %v50_v16 = vpop.permute.xlu0 %49  ;;  %v58_v17 = vpop.permute.xlu1 %57 }
  0x94   :  { %v52_v18 = vadd.f32 %v50_v16, %v38_v13 }
  0x97   :  { %v54_v19 = vpop.permute.xlu0 %53  ;;  %v64_v20 = vpop.permute.xlu1 %63 }
  0x98   :  { %v56_v21 = vadd.f32 %v54_v19, %v52_v18  ;;  %v66_v22 = vadd.f32 %v64_v20, %v46_v15 }
  0x9a   :  { %v60_v23 = vadd.f32 %v58_v17, %v56_v21 }
  0x9b   :  { %v68_v24 = vpop.permute.xlu0 %67  ;;  %v72_v25 = vpop.permute.xlu1 %71 }
  0x9c   :  { %v75_v26 = vmul.f32 0.0625, %v60_v23  ;;  %v70_v27 = vadd.f32 %v68_v24, %v66_v22 }
  0x9e   :  { %v74_v28 = vadd.f32 %v72_v25, %v70_v27  ;;  %v77_v29 = vmul.f32 %v75_v26, %v75_v26 }
  0xa0   :  { %v76_v30 = vmul.f32 0.0625, %v74_v28 }
  0xa2   :  { %v78_v32 = vsub.f32 %v76_v30, %v77_v29 }
  0xa4   :  { %v79_v33 = vmax.f32 %v78_v32, 0.0 }
  0xa6   :  { %v81_v35 = vadd.f32 1e-05, %v79_v33  ;;  %v84_v36 = vmul.f32 0.1, %v79_v33 }
  0xa8   :  { %151 = vrsqrt.f32 %v81_v35  ;;  %v87_v37 = vadd.f32 %v86_v34, %v84_v36 }
  0xaa   :  { %89 = vst.msk [vmem:[#allocation6] sm:$0x1] %vm88_vm1, %v87_v37 }
  0xb2   :  { %v152_v42 = vpop.eup %151 }
  0xb3   :  { %v83_v43 = vmul.f32 %v152_v42, %v80_v40 }
  0xb4   :  { %186 = shalt.err (!%p183_p12)
}
  0xb5   :  { %s187_s12 = scalar_lea.hbm %s317_s4, 16 }
  0xb6   :  { %p188_p13 = scmp.ne.s32.totalorder %s317_s4, %s187_s12  ;;  %p191_p0 = scmp.lt.u32.totalorder %s187_s12, %s317_s4 }
  0xb8   :  { %p193_p1 = pnand %p191_p0, %p188_p13 }
  0xba   :  { %196 = shalt.err (!%p193_p1)
}
  0xbb   :  { %135 = dma.vmem_to_hbm [thread:$0]  %s133_s8, 16, %s317_s4, [#allocation7]   ;;  %v94_v44 = vrot.slane %v83_v43, %v93_v41  ;;  %vm104_vm2 = vcmask 261120   ;;  %vm106_vm3 = vcmask 523264   ;;  %vm108_vm4 = vcmask 785408  }
  0xbc   :  { %s230_s18 = smov [#allocation5]  }
  0xbd   :  { %98 = vrot.lane.b32.xlu1 %v94_v44, %s228_s28  ;;  %95 = vrot.lane.b32.xlu0 %v94_v44, %s227_s27  ;;  %s122_s19 = sshll.u32 %s230_s18, 4  ;;  %s123_s19 = int_to_ptr.vmem [resolvable:$true] %s122_s19 }
  0xbe   :  { %s197_s4 = scalar_lea.vmem %s123_s19, 64  ;;  %p202_p3 = scmp.lt.s32.totalorder %s123_s19, %s123_s19 }
  0xbf   :  { %p198_p2 = scmp.ne.s32.totalorder %s123_s19, %s197_s4  ;;  %p203_p4 = scmp.lt.s32.totalorder %s197_s4, %s197_s4 }
  0xc1   :  { %101 = vrot.lane.b32.xlu0 %v94_v44, %s226_s0  ;;  %p204_p5 = por %p203_p4, %p202_p3 }
  0xc3   :  { %p205_p6 = pnand %p204_p5, %p198_p2 }
 0x12f   :  { %v96_v45 = vpop.permute.xlu0 %95  ;;  %v99_v46 = vpop.permute.xlu1 %98 }
 0x130   :  { %v105_v47 = vsel %vm104_vm2, %v83_v43, %v96_v45 }
 0x131   :  { %v107_v48 = vsel %vm106_vm3, %v105_v47, %v99_v46 }
 0x133   :  { %v102_v49 = vpop.permute.xlu0 %101 }
 0x134   :  { %v109_v50 = vsel %vm108_vm4, %v107_v48, %v102_v49 }
 0x135   :  { %v113_v51 = vrot.slane %v109_v50, %v93_v41 }
 0x137   :  { %v114_v52 = vmul.f32 %v113_v51, %v268_v0 }
 0x139   :  { %115 = vst [vmem:[#allocation5] sm:$0xf] %v114_v52 }
 0x13a   :  { %208 = shalt.err (!%p205_p6)
}
 0x13b   :  { %s209_s22 = scalar_lea.hbm %s316_s3, 64 }
 0x13c   :  { %p210_p7 = scmp.ne.s32.totalorder %s316_s3, %s209_s22  ;;  %p213_p8 = scmp.lt.u32.totalorder %s209_s22, %s316_s3 }
 0x13e   :  { %p215_p9 = pnand %p213_p8, %p210_p7 }
 0x140   :  { %218 = shalt.err (!%p215_p9)
}
 0x141   :  { %125 = dma.vmem_to_hbm [thread:$0]  %s123_s19, 64, %s316_s3, [#allocation4]  }
 0x142   :  { %221 = dma.done.wait [#allocation4], 64  }
 0x143   :  { %222 = vsyncadd [#allocation4], 4294967232 }
 0x144   :  { %223 = dma.done.wait [#allocation7], 16  }
 0x145   :  { %224 = vsyncadd [#allocation7], 4294967280 }
 0x146   :  { %142 = vsyncpa [#allocation3], 1 }
 0x147   :  { %143 = vsyncpa [#allocation4], 1 }
 0x148   :  { %144 = vsyncpa [#allocation7], 1 }

</bundles_post_ra>
